<compile_context>
chip_gen: v6e
topology: v6e:2x2x1
jax: 0.10.0
libtpu: 0.0.40
codegen_flags: <defaults>
</compile_context>

<pallas_src>
import functools
import math

import jax
import jax.numpy as jnp
from jax.experimental import pallas as pl
from jax.experimental.pallas import tpu as pltpu


# ----------------------------- helpers -----------------------------

_VMEM_LIMIT = 48 * 1024 * 1024  # fits v7x 64 MiB/TC; raises v5e's 16 MiB default


def _pick_tile(dim, max_tile, align):
    """Largest t <= max_tile with t % align == 0 and dim % t == 0 (else full dim)."""
    t = min(max_tile, dim)
    t -= t % align
    while t >= align:
        if dim % t == 0:
            return t
        t -= align
    return dim


def _mosaic_params(n_axes):
    return pltpu.CompilerParams(
        dimension_semantics=("parallel",) * n_axes,
        vmem_limit_bytes=_VMEM_LIMIT)


def _gelu(y):
    # tanh-approx GELU, reduced-multiply form; run in the caller's dtype
    # (bf16 on the fc1 path -> cheaper VALU on v6e/v7x, tanh goes to the EUP).
    # TODO(synk): PyTorch nn.GELU defaults to the exact erf formulation; the
    # tanh approximation is used here for guaranteed EUP lowering on TPU.
    c = 0.7978845608028654  # sqrt(2/pi)
    k = 0.044715
    yy = y * y
    inner = y * (c + (c * k) * yy)  # == c*(y + k*y^3) with one fewer multiply
    return 0.5 * y * (1.0 + jnp.tanh(inner))


# ----------------------------- Pallas kernels -----------------------------

def _matmul_kernel(x_ref, w_ref, b_ref, o_ref, *, activation):
    y = jnp.dot(x_ref[...], w_ref[...], preferred_element_type=jnp.float32)
    y = y + b_ref[...].astype(jnp.float32)
    if activation == "gelu":
        y = _gelu(y.astype(jnp.bfloat16))
    o_ref[...] = y.astype(o_ref.dtype)


def _ln_matmul_kernel(x_ref, g_ref, bln_ref, w_ref, b_ref, o_ref, *, eps, activation):
    # Fused LayerNorm prologue (f32 stats) + bf16 MXU matmul + bias (+GELU).
    # Whole-N tiling: runs exactly once per M tile.
    x = x_ref[...].astype(jnp.float32)
    mu = jnp.mean(x, axis=-1, keepdims=True)
    xc = x - mu
    var = jnp.mean(xc * xc, axis=-1, keepdims=True)
    xn = xc * jax.lax.rsqrt(var + eps)
    xn = xn * g_ref[...].astype(jnp.float32) + bln_ref[...].astype(jnp.float32)
    y = jnp.dot(xn.astype(w_ref.dtype), w_ref[...],
                preferred_element_type=jnp.float32)
    y = y + b_ref[...].astype(jnp.float32)
    if activation == "gelu":
        y = _gelu(y.astype(jnp.bfloat16))
    o_ref[...] = y.astype(o_ref.dtype)


def _matmul_scale_res_kernel(x_ref, w_ref, b_ref, ls_ref, res_ref, o_ref):
    # matmul + bias, then LayerScale * y + residual fused as epilogue.
    y = jnp.dot(x_ref[...], w_ref[...], preferred_element_type=jnp.float32)
    y = y + b_ref[...].astype(jnp.float32)
    y = res_ref[...].astype(jnp.float32) + ls_ref[...].astype(jnp.float32) * y
    o_ref[...] = y.astype(o_ref.dtype)


def _layernorm_kernel(x_ref, g_ref, b_ref, o_ref, *, eps):
    x = x_ref[...].astype(jnp.float32)
    mu = jnp.mean(x, axis=-1, keepdims=True)
    xc = x - mu
    var = jnp.mean(xc * xc, axis=-1, keepdims=True)
    y = xc * jax.lax.rsqrt(var + eps)
    y = y * g_ref[...].astype(jnp.float32) + b_ref[...].astype(jnp.float32)
    o_ref[...] = y.astype(o_ref.dtype)


def _attention_kernel(q_ref, k_ref, v_ref, o_ref, *,
                      heads_per_step, head_dim, seq_real):
    # q_ref/k_ref/v_ref: (Sp, heads_per_step*head_dim) bf16 slices of the qkv
    # slab.  The 1/sqrt(head_dim) scale is pre-folded into the qkv weights.
    sp = q_ref.shape[0]
    pad_mask = None
    if seq_real < sp:
        key_idx = jax.lax.broadcasted_iota(jnp.int32, (sp, sp), 1)
        pad_mask = key_idx < seq_real  # hoisted: computed once per grid step
    outs = []
    for h in range(heads_per_step):
        sl = slice(h * head_dim, (h + 1) * head_dim)
        q = q_ref[:, sl]
        k = k_ref[:, sl]
        v = v_ref[:, sl]
        # Contract on the last dim of both operands -> no bf16 transpose of k.
        s = jax.lax.dot_general(q, k, (((1,), (1,)), ((), ())),
                                preferred_element_type=jnp.float32)  # (Sp, Sp)
        if pad_mask is not None:
            s = jnp.where(pad_mask, s, -1e30)  # mask padded keys
        m = jnp.max(s, axis=-1, keepdims=True)
        p = jnp.exp(s - m)
        denom = jnp.sum(p, axis=-1, keepdims=True)
        p = p * pl.reciprocal(denom, approx=True)
        outs.append(jnp.dot(p.astype(v.dtype), v,
                            preferred_element_type=jnp.float32))
    # Single lane-dense full-width store (128/256 lanes) instead of per-head
    # 64-lane masked stores.
    o_ref[...] = jnp.concatenate(outs, axis=-1).astype(o_ref.dtype)


# ----------------------------- kernel wrappers -----------------------------
# All GEMMs tile over M only; the (K, N) weight block index is constant so the
# weight is DMA'd once and stays VMEM-resident across the whole M grid.

def linear(x, w, b, activation=None, out_dtype=jnp.bfloat16):
    """(M, K) @ (K, N) + b; grid over M, weight VMEM-resident."""
    M, K = x.shape
    N = w.shape[1]
    tm = _pick_tile(M, 256, 16)
    return pl.pallas_call(
        functools.partial(_matmul_kernel, activation=activation),
        out_shape=jax.ShapeDtypeStruct((M, N), out_dtype),
        grid=(M // tm,),
        in_specs=[
            pl.BlockSpec((tm, K), lambda i: (i, 0)),
            pl.BlockSpec((K, N), lambda i: (0, 0)),   # resident weight
            pl.BlockSpec((1, N), lambda i: (0, 0)),
        ],
        out_specs=pl.BlockSpec((tm, N), lambda i: (i, 0)),
        compiler_params=_mosaic_params(1),
    )(x, w, b.reshape(1, N))


def ln_linear(x, gamma, beta, w, b, activation=None, eps=1e-6,
              out_dtype=jnp.bfloat16):
    """LayerNorm(x) @ w + b (+GELU); LN fused, runs once per M tile."""
    M, K = x.shape
    N = w.shape[1]
    tm = _pick_tile(M, 256, 16)
    return pl.pallas_call(
        functools.partial(_ln_matmul_kernel, eps=eps, activation=activation),
        out_shape=jax.ShapeDtypeStruct((M, N), out_dtype),
        grid=(M // tm,),
        in_specs=[
            pl.BlockSpec((tm, K), lambda i: (i, 0)),
            pl.BlockSpec((1, K), lambda i: (0, 0)),
            pl.BlockSpec((1, K), lambda i: (0, 0)),
            pl.BlockSpec((K, N), lambda i: (0, 0)),   # resident weight
            pl.BlockSpec((1, N), lambda i: (0, 0)),
        ],
        out_specs=pl.BlockSpec((tm, N), lambda i: (i, 0)),
        compiler_params=_mosaic_params(1),
    )(x, gamma.reshape(1, K), beta.reshape(1, K), w, b.reshape(1, N))


def linear_scale_res(x, w, b, ls, res, out_dtype=jnp.bfloat16):
    """res + ls * (x @ w + b); LayerScale + residual fused as epilogue."""
    M, K = x.shape
    N = w.shape[1]
    tm = _pick_tile(M, 256, 16)
    return pl.pallas_call(
        _matmul_scale_res_kernel,
        out_shape=jax.ShapeDtypeStruct((M, N), out_dtype),
        grid=(M // tm,),
        in_specs=[
            pl.BlockSpec((tm, K), lambda i: (i, 0)),
            pl.BlockSpec((K, N), lambda i: (0, 0)),   # resident weight
            pl.BlockSpec((1, N), lambda i: (0, 0)),
            pl.BlockSpec((1, N), lambda i: (0, 0)),
            pl.BlockSpec((tm, N), lambda i: (i, 0)),
        ],
        out_specs=pl.BlockSpec((tm, N), lambda i: (i, 0)),
        compiler_params=_mosaic_params(1),
    )(x, w, b.reshape(1, N), ls.reshape(1, N), res)


def layernorm(x, gamma, beta, eps=1e-6, out_dtype=jnp.float32):
    M, D = x.shape
    tm = _pick_tile(M, 512, 8)
    return pl.pallas_call(
        functools.partial(_layernorm_kernel, eps=eps),
        out_shape=jax.ShapeDtypeStruct((M, D), out_dtype),
        grid=(M // tm,),
        in_specs=[
            pl.BlockSpec((tm, D), lambda i: (i, 0)),
            pl.BlockSpec((1, D), lambda i: (0, 0)),
            pl.BlockSpec((1, D), lambda i: (0, 0)),
        ],
        out_specs=pl.BlockSpec((tm, D), lambda i: (i, 0)),
        compiler_params=_mosaic_params(1),
    )(x, gamma.reshape(1, D), beta.reshape(1, D))


def attention_from_qkv(qkv, B, Sp, num_heads, head_dim, seq_real,
                       out_dtype=jnp.bfloat16):
    """Softmax attention reading q/k/v directly from the (B*Sp, 3D) qkv slab.

    Grid = (batch, head-group); up to 4 heads per step so output blocks are
    128/256 lanes wide (lane-dense single store).  Output is written directly
    in the (B*Sp, D) layout consumed by the projection matmul.
    """
    D = num_heads * head_dim
    if num_heads % 4 == 0:
        HP = 4
    elif num_heads % 2 == 0:
        HP = 2
    else:
        HP = 1
    blk_c = HP * head_dim
    n_groups = num_heads // HP
    kern = functools.partial(
        _attention_kernel, heads_per_step=HP, head_dim=head_dim,
        seq_real=seq_real)
    return pl.pallas_call(
        kern,
        out_shape=jax.ShapeDtypeStruct((B * Sp, D), out_dtype),
        grid=(B, n_groups),
        in_specs=[
            pl.BlockSpec((Sp, blk_c), lambda b, h: (b, h)),                 # q
            pl.BlockSpec((Sp, blk_c), lambda b, h: (b, h + n_groups)),      # k
            pl.BlockSpec((Sp, blk_c), lambda b, h: (b, h + 2 * n_groups)),  # v
        ],
        out_specs=pl.BlockSpec((Sp, blk_c), lambda b, h: (b, h)),
        compiler_params=_mosaic_params(2),
    )(qkv, qkv, qkv)


# --------------------------- ViT forward (glue) ----------------------------

def patch_embed(x, w_conv, b, patch):
    """Conv2d(kernel=stride=patch) == im2col reshape + Pallas matmul."""
    B, C, H, W = x.shape
    gh, gw = H // patch, W // patch
    x = x.astype(jnp.bfloat16)  # cast before the im2col transpose (half HBM traffic)
    xp = x.reshape(B, C, gh, patch, gw, patch)
    xp = xp.transpose(0, 2, 4, 1, 3, 5).reshape(B * gh * gw, C * patch * patch)
    w2 = w_conv.reshape(w_conv.shape[0], -1).T  # (C*p*p, D)
    K = xp.shape[1]
    Kp = ((K + 127) // 128) * 128               # pad ragged K (588 -> 640)
    if Kp != K:
        xp = jnp.pad(xp, ((0, 0), (0, Kp - K)))
        w2 = jnp.pad(w2, ((0, Kp - K), (0, 0)))
    out = linear(xp, w2.astype(jnp.bfloat16), b.astype(jnp.float32))
    return out.reshape(B, gh * gw, -1)


def block_forward(x2, p, B, Sp, num_heads, head_dim, seq_real):
    # Attention branch: LN fused into qkv matmul; proj fused w/ LayerScale+residual.
    qkv = ln_linear(x2, p["ln1_g"], p["ln1_b"], p["qkv_w"], p["qkv_b"])
    a = attention_from_qkv(qkv, B, Sp, num_heads, head_dim, seq_real)
    x2 = linear_scale_res(a, p["proj_w"], p["proj_b"], p["ls1"], x2)
    # MLP branch: LN+GELU fused into fc1; fc2 fused w/ LayerScale+residual.
    h = ln_linear(x2, p["ln2_g"], p["ln2_b"], p["fc1_w"], p["fc1_b"],
                  activation="gelu")
    x2 = linear_scale_res(h, p["fc2_w"], p["fc2_b"], p["ls2"], x2)
    return x2


def vit_forward(x, params, cfg):
    B = x.shape[0]
    D, H = cfg["dim"], cfg["heads"]
    Dh = D // H

    tokens = patch_embed(x, params["patch_w"], params["patch_b"], cfg["patch"])
    cls = jnp.broadcast_to(params["cls"].astype(jnp.bfloat16), (B, 1, D))
    tokens = jnp.concatenate([cls, tokens], axis=1) + params["pos"].astype(jnp.bfloat16)

    S = tokens.shape[1]
    Sp = ((S + 15) // 16) * 16  # pad to a 16-row (bf16 packed-tile) multiple
    if Sp != S:
        tokens = jnp.pad(tokens, ((0, 0), (0, Sp - S), (0, 0)))

    x2 = tokens.reshape(B * Sp, D).astype(jnp.bfloat16)  # bf16 residual stream

    for blk in params["blocks"]:
        x2 = block_forward(x2, blk, B, Sp, H, Dh, S)

    # Final LayerNorm on the CLS rows only (DinoV2 forward(): head(x_norm_clstoken),
    # head = Identity) -> saves ~Sp x f32 compute + writeback.
    cls_rows = x2.reshape(B, Sp, D)[:, 0]            # (B, D) bf16
    out = layernorm(cls_rows, params["ln_f_g"], params["ln_f_b"],
                    out_dtype=jnp.float32)
    return out


# ------------------------------- params -----------------------------------

def init_params(key, cfg):
    D = cfg["dim"]
    C = cfg["in_chans"]
    patch = cfg["patch"]
    mlp = 4 * D
    N = cfg["num_patches"]
    keys = iter(jax.random.split(key, 64))

    def nrm(shape, dtype=jnp.bfloat16):
        return (0.02 * jax.random.normal(next(keys), shape)).astype(dtype)

    params = {
        "patch_w": nrm((D, C, patch, patch)),
        "patch_b": jnp.zeros((D,), jnp.float32),
        "cls": nrm((1, 1, D), jnp.float32),
        "pos": nrm((1, N + 1, D), jnp.float32),
        "ln_f_g": jnp.ones((D,), jnp.float32),
        "ln_f_b": jnp.zeros((D,), jnp.float32),
        "blocks": [],
    }
    for _ in range(cfg["depth"]):
        params["blocks"].append({
            "ln1_g": jnp.ones((D,), jnp.float32),
            "ln1_b": jnp.zeros((D,), jnp.float32),
            "qkv_w": nrm((D, 3 * D)),
            "qkv_b": jnp.zeros((3 * D,), jnp.float32),
            "proj_w": nrm((D, D)),
            "proj_b": jnp.zeros((D,), jnp.float32),
            "ls1": jnp.full((D,), 1e-5, jnp.float32),  # DinoV2 LayerScale init
            "ln2_g": jnp.ones((D,), jnp.float32),
            "ln2_b": jnp.zeros((D,), jnp.float32),
            "fc1_w": nrm((D, mlp)),
            "fc1_b": jnp.zeros((mlp,), jnp.float32),
            "fc2_w": nrm((mlp, D)),
            "fc2_b": jnp.zeros((D,), jnp.float32),
            "ls2": jnp.full((D,), 1e-5, jnp.float32),
        })
    return params


def fold_attention_scale(params, num_heads):
    """One-time parameter prep: fold 1/sqrt(head_dim) into the q-third of the
    qkv weights/bias so the attention kernel never scales q in-kernel."""
    D = params["blocks"][0]["qkv_w"].shape[0]
    head_dim = D // num_heads
    scale = 1.0 / math.sqrt(head_dim)
    new_blocks = []
    for p in params["blocks"]:
        p = dict(p)
        qkv_w = p["qkv_w"]
        q_w = (qkv_w[:, :D].astype(jnp.float32) * scale).astype(qkv_w.dtype)
        p["qkv_w"] = jnp.concatenate([q_w, qkv_w[:, D:]], axis=1)
        p["qkv_b"] = p["qkv_b"].at[:D].multiply(scale)
        new_blocks.append(p)
    out = dict(params)
    out["blocks"] = new_blocks
    return out


# -------------------------------- main -------------------------------------

if __name__ == "__main__":
    # Small config consistent with DinoV2 ViT-B/14 structure:
    # patch=14, 3 input channels, depth-2 / dim-128 / 2-head transformer,
    # 28x28 image -> 2x2 = 4 patches -> seq len 5 with the CLS token (padded to 16).
    cfg = {
        "patch": 14,
        "in_chans": 3,
        "dim": 128,
        "heads": 2,
        "depth": 2,
        "img": 28,
    }
    cfg["num_patches"] = (cfg["img"] // cfg["patch"]) ** 2

    key = jax.random.PRNGKey(0)
    k_param, k_x = jax.random.split(key)
    params = init_params(k_param, cfg)
    params = fold_attention_scale(params, cfg["heads"])  # one-time weight transform

    x = jax.random.normal(k_x, (2, cfg["in_chans"], cfg["img"], cfg["img"]),
                          jnp.float32)

    out = vit_forward(x, params, cfg)
    out = jax.block_until_ready(out)
    assert out.shape == (2, cfg["dim"])
    print("KERNEL_OK")
</pallas_src>

<mosaic_0001>
module attributes {stable_mosaic.version = 11 : i64} {
  func.func @_matmul_kernel(%arg0: i32, %arg1: memref<8x640xbf16, #tpu.memory_space<vmem>>, %arg2: memref<640x128xbf16, #tpu.memory_space<vmem>>, %arg3: memref<1x128xf32, #tpu.memory_space<vmem>>, %arg4: memref<8x128xbf16, #tpu.memory_space<vmem>>) attributes {dimension_semantics = [#tpu.dimension_semantics<parallel>], iteration_bounds = array<i64: 1>, scalar_prefetch = 0 : i64, scratch_operands = 0 : i64, tpu.core_type = #tpu.core_type<tc>, window_params = [{transform_indices = @transform_0, window_bounds = array<i64: 8, 640>}, {pipeline_mode = #tpu.pipeline_mode<synchronous>, transform_indices = @transform_1, window_bounds = array<i64: 640, 128>}, {pipeline_mode = #tpu.pipeline_mode<synchronous>, transform_indices = @transform_2, window_bounds = array<i64: 1, 128>}, {transform_indices = @transform_3, window_bounds = array<i64: 8, 128>}]} {
    %c0 = arith.constant 0 : index
    %c0_0 = arith.constant 0 : index
    %0 = vector.load %arg1[%c0, %c0_0] : memref<8x640xbf16, #tpu.memory_space<vmem>>, vector<8x640xbf16>
    %c0_1 = arith.constant 0 : index
    %c0_2 = arith.constant 0 : index
    %1 = vector.load %arg2[%c0_1, %c0_2] : memref<640x128xbf16, #tpu.memory_space<vmem>>, vector<640x128xbf16>
    %cst = arith.constant dense<0.000000e+00> : vector<8x128xf32>
    %2 = tpu.matmul %0, %1, %cst {dimension_numbers = #tpu.dot_dimension_numbers<[1], [0], [0], [1], [0, 0, 1, 1], [], []>} : vector<8x640xbf16>, vector<640x128xbf16>, vector<8x128xf32> -> vector<8x128xf32>
    %c0_3 = arith.constant 0 : index
    %c0_4 = arith.constant 0 : index
    %3 = vector.load %arg3[%c0_3, %c0_4] : memref<1x128xf32, #tpu.memory_space<vmem>>, vector<1x128xf32>
    %4 = vector.broadcast %3 : vector<1x128xf32> to vector<8x128xf32>
    %5 = arith.addf %2, %4 : vector<8x128xf32>
    %6 = arith.truncf %5 : vector<8x128xf32> to vector<8x128xbf16>
    %c0_5 = arith.constant 0 : index
    %c0_6 = arith.constant 0 : index
    %7 = vector.load %arg4[%c0_5, %c0_6] : memref<8x128xbf16, #tpu.memory_space<vmem>>, vector<8x128xbf16>
    tpu.vector_store %arg4[%c0_5, %c0_6], %6 {strides = array<i32>} : memref<8x128xbf16, #tpu.memory_space<vmem>>, vector<8x128xbf16>,
    return
  }
  func.func @transform_0(%arg0: i32) -> (i32, i32) {
    %c0_i32 = arith.constant 0 : i32
    %c0_i32_0 = arith.constant 0 : i32
    return %arg0, %c0_i32 : i32, i32
  }
  func.func @transform_1(%arg0: i32) -> (i32, i32) {
    %c0_i32 = arith.constant 0 : i32
    %c0_i32_0 = arith.constant 0 : i32
    %c0_i32_1 = arith.constant 0 : i32
    return %c0_i32, %c0_i32_0 : i32, i32
  }
  func.func @transform_2(%arg0: i32) -> (i32, i32) {
    %c0_i32 = arith.constant 0 : i32
    %c0_i32_0 = arith.constant 0 : i32
    %c0_i32_1 = arith.constant 0 : i32
    return %c0_i32, %c0_i32_0 : i32, i32
  }
  func.func @transform_3(%arg0: i32) -> (i32, i32) {
    %c0_i32 = arith.constant 0 : i32
    %c0_i32_0 = arith.constant 0 : i32
    return %arg0, %c0_i32 : i32, i32
  }
}

</mosaic_0001>

<bundles_post_ra>
// kernel: tpu_custom_call.1
= control target key start
LH: loop header
LB: loop body
LE: loop exit
PB: predicated region body
PF: predicated region fallthrough
CT: control target
= control target key end

     0   :  { %8 = vsyncpa [#allocation3], 0  ;;  %s804_s0 = inlined_call_operand.hbm [shape: bf16[8,640], index: 0, kind: input, shape index: {}]   ;;  %s805_s1 = inlined_call_operand.hbm [shape: bf16[640,128], index: 1, kind: input, shape index: {}]   ;;  %s806_s2 = inlined_call_operand.vmem [shape: f32[1,128], index: 2, kind: input, shape index: {}]   ;;  %s807_s3 = inlined_call_operand.hbm [shape: bf16[8,128], index: 3, kind: output, shape index: {}]  }
   0x1   :  { %9 = vsyncpa [#allocation6], 0 }
   0x2   :  { %10 = vsyncpa [#allocation4], 0  ;;  %s765_s12 = smov [#allocation2]   ;;  %s766_s14 = smov [#allocation5]  }
   0x3   :  { %s17_s13 = sshll.u32 %s765_s12, 4  ;;  %s26_s15 = sshll.u32 %s766_s14, 4  ;;  %s18_s13 = int_to_ptr.vmem [resolvable:$true] %s17_s13  ;;  %s27_s15 = int_to_ptr.vmem [resolvable:$true] %s26_s15 }
   0x4   :  { %s707_s16 = scalar_lea.vmem %s18_s13, 320  ;;  %p712_p1 = scmp.lt.s32.totalorder %s18_s13, %s18_s13 }
   0x5   :  { %p708_p0 = scmp.ne.s32.totalorder %s18_s13, %s707_s16  ;;  %p713_p2 = scmp.lt.s32.totalorder %s707_s16, %s707_s16 }
   0x7   :  { %p714_p3 = por %p713_p2, %p712_p1 }
   0x9   :  { %p715_p4 = pnand %p714_p3, %p708_p0 }
   0xb   :  { %718 = shalt.err (!%p715_p4)
}
   0xc   :  { %20 = dma.hbm_to_vmem [thread:$0]  %s804_s0, 320, %s18_s13, [#allocation3]  }
   0xd   :  { %s727_s19 = scalar_lea.vmem %s27_s15, 5120  ;;  %p732_p6 = scmp.lt.s32.totalorder %s27_s15, %s27_s15 }
   0xe   :  { %p728_p5 = scmp.ne.s32.totalorder %s27_s15, %s727_s19  ;;  %p733_p7 = scmp.lt.s32.totalorder %s727_s19, %s727_s19 }
  0x10   :  { %p734_p8 = por %p733_p7, %p732_p6 }
  0x12   :  { %p735_p9 = pnand %p734_p8, %p728_p5 }
  0x14   :  { %738 = shalt.err (!%p735_p9)
}
  0x15   :  { %s767_s20 = smov 64   ;;  %s768_s21 = smov 4  }
  0x16   :  { %32 = dma.hbm_to_vmem [thread:$0]  %s805_s1, 5120, %s27_s15, [#allocation6], %s767_s20, %s767_s20, %s768_s21  }
  0x17   :  { %759 = dma.done.wait [#allocation3], 320  }
  0x18   :  { %760 = vsyncadd [#allocation3], 4294966976 }
  0x19   :  { %761 = dma.done.wait [#allocation6], 5120  }
  0x1a   :  { %762 = vsyncadd [#allocation6], 4294962176  ;;  %v654_v0 = vld [vmem:[#allocation5 + $0x78] sm:$0xff]   ;;  %v658_v4 = vld [vmem:[#allocation5 + $0x70] sm:$0xff]   ;;  %v769_v35 = vmov 0.0   ;;  %vm770_vm0 = vmmov 0  }
  0x1b   :  { %v655_v1 = vld [vmem:[#allocation5 + $0x38] sm:$0xff]   ;;  %574 = vmatprep.subr.bf16.mxu0 %v654_v0  ;;  %v659_v5 = vld [vmem:[#allocation5 + $0x30] sm:$0xff]   ;;  %v662_v8 = vld [vmem:[#allocation5 + $0x68] sm:$0xff]   ;;  %s771_s24 = smov [#allocation7]  }
  0x1c   :  { %v656_v2 = vld [vmem:[#allocation5 + $0xf8] sm:$0xff]   ;;  %575 = vmatpush3.bf16.msra.mxu0 %v655_v1  ;;  %v660_v6 = vld [vmem:[#allocation5 + $0xf0] sm:$0xff]   ;;  %v663_v9 = vld [vmem:[#allocation5 + $0x28] sm:$0xff]   ;;  %s518_s25 = sshll.u32 %s771_s24, 4  ;;  %s519_s25 = int_to_ptr.vmem [resolvable:$true] %s518_s25 }
  0x1d   :  { %v657_v3 = vld [vmem:[#allocation5 + $0xb8] sm:$0xff]   ;;  %596 = vmatprep.subr.bf16.mxu1 %v656_v2  ;;  %576 = vmatprep.subr.bf16.mxu0 %v658_v4  ;;  %v661_v7 = vld [vmem:[#allocation5 + $0xb0] sm:$0xff]   ;;  %v664_v10 = vld [vmem:[#allocation5 + $0xe8] sm:$0xff]   ;;  %s739_s26 = scalar_lea.vmem %s519_s25, 64  ;;  %p744_p11 = scmp.lt.s32.totalorder %s519_s25, %s519_s25 }
  0x1e   :  { %597 = vmatpush3.bf16.msra.mxu1 %v657_v3  ;;  %v665_v11 = vld [vmem:[#allocation5 + $0xa8] sm:$0xff]   ;;  %v666_v12 = vld [vmem:[#allocation5 + $0x60] sm:$0xff]   ;;  %v670_v16 = vld [vmem:[#allocation5 + $0x58] sm:$0xff]   ;;  %p740_p10 = scmp.ne.s32.totalorder %s519_s25, %s739_s26  ;;  %p745_p12 = scmp.lt.s32.totalorder %s739_s26, %s739_s26 }
  0x1f   :  { %598 = vmatprep.subr.bf16.mxu1 %v660_v6  ;;  %v667_v13 = vld [vmem:[#allocation5 + $0x20] sm:$0xff]   ;;  %v671_v17 = vld [vmem:[#allocation5 + $0x18] sm:$0xff]   ;;  %v674_v20 = vld [vmem:[#allocation5 + $0x50] sm:$0xff]  }
  0x20   :  { %577 = vmatpush3.bf16.msra.mxu0 %v659_v5  ;;  %v668_v14 = vld [vmem:[#allocation5 + $0xe0] sm:$0xff]   ;;  %v672_v18 = vld [vmem:[#allocation5 + $0xd8] sm:$0xff]   ;;  %v675_v21 = vld [vmem:[#allocation5 + $0x10] sm:$0xff]   ;;  %p746_p13 = por %p745_p12, %p744_p11 }
  0x21   :  { %578 = vmatprep.subr.bf16.mxu0 %v662_v8  ;;  %v669_v15 = vld [vmem:[#allocation5 + $0xa0] sm:$0xff]   ;;  %v673_v19 = vld [vmem:[#allocation5 + $0x98] sm:$0xff]   ;;  %v676_v22 = vld [vmem:[#allocation5 + $0xd0] sm:$0xff]  }
  0x22   :  { %599 = vmatpush3.bf16.msra.mxu1 %v661_v7  ;;  %v677_v23 = vld [vmem:[#allocation5 + $0x90] sm:$0xff]   ;;  %v678_v24 = vld [vmem:[#allocation5 + $0x48] sm:$0xff]   ;;  %v682_v28 = vld [vmem:[#allocation5 + $0x40] sm:$0xff]   ;;  %p747_p0 = pnand %p746_p13, %p740_p10 }
  0x23   :  { %600 = vmatprep.subr.bf16.mxu1 %v664_v10  ;;  %v679_v25 = vld [vmem:[#allocation5 + $0x8] sm:$0xff]   ;;  %v683_v29 = vld [vmem:[#allocation5] sm:$0xff]   ;;  %v43_v36 = vld [vmem:[#allocation2 + $0x8] sm:$0xff] }
  0x24   :  { %579 = vmatpush3.bf16.msra.mxu0 %v663_v9  ;;  %v680_v26 = vld [vmem:[#allocation5 + $0xc8] sm:$0xff]   ;;  %v684_v30 = vld [vmem:[#allocation5 + $0xc0] sm:$0xff]   ;;  %v531_v37 = vcombine.low %v43_v36, %v43_v36  ;;  %v532_v38 = vcombine.high %v43_v36, %v43_v36  ;;  %v690_v39 = vld [vmem:[#allocation5 + $0x138] sm:$0xff]  }
  0x25   :  { %580 = vmatprep.subr.bf16.mxu0 %v666_v12  ;;  %v681_v27 = vld [vmem:[#allocation5 + $0x88] sm:$0xff]   ;;  %v687_v34 = vld [vmem:[#allocation5 + $0x80] sm:$0xff]   ;;  %v691_v40 = vld [vmem:[#allocation5 + $0x130] sm:$0xff]  }
  0x26   :  { %601 = vmatpush3.bf16.msra.mxu1 %v665_v11  ;;  %v42_v31 = vld [vmem:[#allocation2] sm:$0xff]  ;;  %462 = vmatprep.mubr.bf16.mxu1 %v532_v38  ;;  %v693_v42 = vld [vmem:[#allocation5 + $0x120] sm:$0xff]   ;;  %v694_v43 = vld [vmem:[#allocation5 + $0x118] sm:$0xff]  }
  0x27   :  { %602 = vmatprep.subr.bf16.mxu1 %v668_v14  ;;  %v529_v32 = vcombine.low %v42_v31, %v42_v31  ;;  %v530_v33 = vcombine.high %v42_v31, %v42_v31  ;;  %v692_v41 = vld [vmem:[#allocation5 + $0x128] sm:$0xff]   ;;  %v695_v44 = vld [vmem:[#allocation5 + $0x110] sm:$0xff]   ;;  %v697_v46 = vld [vmem:[#allocation5 + $0x100] sm:$0xff]  }
  0x28   :  { %581 = vmatpush3.bf16.msra.mxu0 %v667_v13  ;;  %v696_v45 = vld [vmem:[#allocation5 + $0x108] sm:$0xff]   ;;  %v698_v47 = vld [vmem:[#allocation2 + $0x10] ss:$0 sps:$4 sm:$0xff]  }
  0x29   :  { %582 = vmatprep.subr.bf16.mxu0 %v670_v16  ;;  %422 = vmatprep.mubr.bf16.mxu0 %v530_v33  ;;  %v528_v57 = vld [vmem:[%s806_s2] ss:$0 sm:$0xff] }
  0x2a   :  { %603 = vmatpush3.bf16.msra.mxu1 %v669_v15 }
  0x2b   :  { %604 = vmatprep.subr.bf16.mxu1 %v672_v18 }
  0x2c   :  { %583 = vmatpush3.bf16.msra.mxu0 %v671_v17 }
  0x2d   :  { %584 = vmatprep.subr.bf16.mxu0 %v674_v20 }
  0x2e   :  { %605 = vmatpush3.bf16.msra.mxu1 %v673_v19 }
  0x2f   :  { %606 = vmatprep.subr.bf16.mxu1 %v676_v22 }
  0x30   :  { %585 = vmatpush3.bf16.msra.mxu0 %v675_v21 }
  0x31   :  { %586 = vmatprep.subr.bf16.mxu0 %v678_v24 }
  0x32   :  { %607 = vmatpush3.bf16.msra.mxu1 %v677_v23 }
  0x33   :  { %608 = vmatprep.subr.bf16.mxu1 %v680_v26 }
  0x34   :  { %587 = vmatpush3.bf16.msra.mxu0 %v679_v25 }
  0x35   :  { %588 = vmatprep.subr.bf16.mxu0 %v682_v28 }
  0x36   :  { %609 = vmatpush3.bf16.msra.mxu1 %v681_v27 }
  0x37   :  { %610 = vmatprep.subr.bf16.mxu1 %v684_v30 }
  0x38   :  { %589 = vmatpush3.bf16.msra.mxu0 %v683_v29 }
  0x39   :  { %627 = vmatprep.subr.bf16.mxu0 %v769_v35 }
  0x3a   :  { %611 = vmatpush3.bf16.msra.mxu1 %v687_v34 }
  0x3b   :  { %423 = vmatmul.mubr.bf16.vlgmr.msra.gmra.mxu0 %v529_v32 }
  0x3c   :  { %628 = vmatpush3.bf16.msra.mxu0 %v690_v39  ;;  %643 = vmatprep.mubr.msk.bf16.mxu0 %vm770_vm0, %v769_v35 }
  0x3d   :  { %463 = vmatmul.mubr.bf16.vlgmr.msra.gmra.mxu1 %v531_v37  ;;  %629 = vmatprep.subr.bf16.mxu0 %v769_v35 }
  0x40   :  { %630 = vmatpush3.bf16.msra.mxu0 %v691_v40 }
  0x41   :  { %631 = vmatprep.subr.bf16.mxu0 %v769_v35 }
  0x44   :  { %632 = vmatpush3.bf16.msra.mxu0 %v692_v41 }
  0x45   :  { %633 = vmatprep.subr.bf16.mxu0 %v769_v35 }
  0x48   :  { %634 = vmatpush3.bf16.msra.mxu0 %v693_v42 }
  0x49   :  { %635 = vmatprep.subr.bf16.mxu0 %v769_v35 }
  0x4c   :  { %636 = vmatpush3.bf16.msra.mxu0 %v694_v43 }
  0x4d   :  { %637 = vmatprep.subr.bf16.mxu0 %v769_v35 }
  0x50   :  { %638 = vmatpush3.bf16.msra.mxu0 %v695_v44 }
  0x51   :  { %639 = vmatprep.subr.bf16.mxu0 %v769_v35 }
  0x54   :  { %640 = vmatpush3.bf16.msra.mxu0 %v696_v45 }
  0x55   :  { %641 = vmatprep.subr.bf16.mxu0 %v769_v35 }
  0x58   :  { %642 = vmatpush3.bf16.msra.mxu0 %v697_v46 }
  0x5b   :  { %644 = vmatmul.mubr.bf16.vlgmr.msra.gmra.mxu0 %v698_v47 }
  0xfb   :  { %v590_v48 = vpop.f32.mrf.mxu0 }
  0xfd   :  { %v591_v49 = vpop.f32.mrf.mxu0  ;;  %v612_v50 = vpop.f32.mrf.mxu1 }
  0xfe   :  { %v592_v56 = vadd.f32 %v591_v49, %v590_v48 }
  0xff   :  { %v593_v51 = vpop.f32.mrf.mxu0  ;;  %v613_v52 = vpop.f32.mrf.mxu1 }
 0x100   :  { %v425_v58 = vadd.f32 %v592_v56, %v528_v57  ;;  %v614_v59 = vadd.f32 %v613_v52, %v612_v50 }
 0x101   :  { %v594_v53 = vpop.f32.mrf.mxu0  ;;  %v615_v54 = vpop.f32.mrf.mxu1 }
 0x102   :  { %v465_v60 = vadd.f32 %v614_v59, %v425_v58 }
 0x103   :  { %v616_v55 = vpop.f32.mrf.mxu1 }
 0x11b   :  { %v504_v61 = vpop.f32.mrf.mxu0 }
 0x11c   :  { %v505_v62 = vadd.f32 %v504_v61, %v465_v60 }
 0x11d   :  { %v645_v63 = vpop.f32.mrf.mxu0 }
 0x11e   :  { %v510_v0 = vpack.c.bf16 %v505_v62, %v505_v62 }
 0x11f   :  { %v507_v1 = vpop.f32.mrf.mxu0 }
 0x120   :  { %511 = vst [vmem:[#allocation7] sm:$0xf] %v510_v0 }
 0x121   :  { %v646_v2 = vpop.f32.mrf.mxu0 }
 0x122   :  { %750 = shalt.err (!%p747_p0)
}
 0x123   :  { %521 = dma.vmem_to_hbm [thread:$0]  %s519_s25, 64, %s807_s3, [#allocation4]  }
 0x124   :  { %763 = dma.done.wait [#allocation4], 64  }
 0x125   :  { %764 = vsyncadd [#allocation4], 4294967232 }
 0x126   :  { %525 = vsyncpa [#allocation3], 1 }
 0x127   :  { %526 = vsyncpa [#allocation6], 1 }
 0x128   :  { %527 = vsyncpa [#allocation4], 1 }

</bundles_post_ra>
